<compile_context>
chip_gen: v5e
topology: v5e:2x2
jax: 0.10.0
libtpu: 0.0.40
codegen_flags: <defaults>
</compile_context>

<pallas_src>
import functools

import jax
import jax.numpy as jnp
import numpy as np
from jax import lax
from jax.experimental import pallas as pl
from jax.experimental.pallas import tpu as pltpu

_EPS = 1e-12  # matches F.normalize default eps


def _l2_normalize(x, eps=_EPS):
    ss = jnp.sum(x * x, axis=-1, keepdims=True)
    # 1 / max(||x||, eps) via the EUP rsqrt path.
    return x * lax.rsqrt(jnp.maximum(ss, eps * eps))


def _round_up(x, m):
    return -(-x // m) * m


def _moco_kernel(proj_ref, pred_vm_ref, q_ref,
                 projn_ref, gl_ref, ga_ref, ll_ref, la_ref,
                 pred_mm_ref, predn_ref, acc_ref, *,
                 temperature, num_global_views, num_local_views, batch,
                 queue_len, queue_tile, mask_tail):
    # proj_ref:    (B, Vg, D)            resident (constant block index)
    # pred_vm_ref: (m_pad, D)            view-major predicted, zero-padded rows
    # q_ref:       (queue_tile, D)       streamed queue tile (natural layout)
    # projn_ref:   (B, Vg, D)            normalized projected (output)
    # gl/ga/ll/la: (B, 1)                per-batch pair sums (outputs)
    # pred_mm_ref: (m_pad, D) mm dtype   normalized pred * 1/T (MXU operand)
    # predn_ref:   (m_pad, D) f32        normalized pred (for positive logits)
    # acc_ref:     (m_pad, 128) f32      lane-chunked partial exp sums
    B = batch
    Vg = num_global_views
    Vl = num_local_views
    inv_t = jnp.float32(1.0 / temperature)
    k = pl.program_id(0)

    @pl.when(k == 0)
    def _init():
        predn = _l2_normalize(pred_vm_ref[...].astype(jnp.float32))
        predn_ref[...] = predn
        # 1/T folded into the MXU operand so the matmul already yields logits.
        pred_mm_ref[...] = (predn * inv_t).astype(pred_mm_ref.dtype)
        acc_ref[...] = jnp.zeros_like(acc_ref)

    # One batched MXU matmul per queue tile, contracting on D against the
    # natural-layout tile: (m_pad, D) x (Qt, D)^T -> (m_pad, Qt) scaled logits.
    neg = lax.dot_general(
        pred_mm_ref[...], q_ref[...],
        dimension_numbers=(((1,), (1,)), ((), ())),
        preferred_element_type=jnp.float32)

    # Logits are bounded by 1/T (unit-norm operands, MoCo invariant for the
    # queue), so a compile-time shift replaces the online running max.
    # TODO(synk): compute this exp on bf16 operands on v6e/v7x (EUP bf16 path).
    e = jnp.exp(neg - inv_t)
    if mask_tail:
        col = lax.broadcasted_iota(jnp.int32, e.shape, 1) + k * queue_tile
        e = jnp.where(col < queue_len, e, 0.0)

    # VPU-side partial sums over the Qt/128 lane chunks; the single cross-lane
    # (128 -> 1) reduce happens once in the finalize step.
    part = e[:, 0:128]
    for c in range(1, queue_tile // 128):
        part = part + e[:, c * 128:(c + 1) * 128]
    acc_ref[...] += part

    @pl.when(k == pl.num_programs(0) - 1)
    def _finalize():
        projn = _l2_normalize(proj_ref[...].astype(jnp.float32))   # (B, Vg, D)
        projn_ref[...] = projn.astype(projn_ref.dtype)
        predn = predn_ref[...]                                     # (m_pad, D)
        s_all = jnp.sum(acc_ref[...], axis=-1, keepdims=True)      # (m_pad, 1)

        def pair_terms(i, ii):
            # Positive logit (label 0) for pair (proj view i, pred view ii).
            lp = jnp.sum(predn[ii * B:(ii + 1) * B, :] * projn[:, i, :],
                         axis=-1, keepdims=True) * inv_t           # (B, 1)
            sv = s_all[ii * B:(ii + 1) * B]                        # (B, 1)
            lse = inv_t + jnp.log(jnp.exp(lp - inv_t) + sv)
            return lse - lp, jnp.exp(lp - lse)   # CE (label 0), softmax prob

        zero = jnp.zeros((B, 1), jnp.float32)
        g_loss, g_align = zero, zero
        for i in range(Vg):
            for ii in range(Vg):
                if i == ii:
                    continue
                l, a = pair_terms(i, ii)
                g_loss = g_loss + l
                g_align = g_align + a

        l_loss, l_align = zero, zero
        for i in range(Vg):
            for ii in range(Vl):
                # NB: matches the PyTorch reference exactly: predicted[:, ii],
                # i.e. the first Vl prediction columns (not offset by Vg).
                l, a = pair_terms(i, ii)
                l_loss = l_loss + l
                l_align = l_align + a

        gl_ref[...] = g_loss
        ga_ref[...] = g_align
        ll_ref[...] = l_loss
        la_ref[...] = l_align


def _pick_queue_tile(q_len, d, m_pad, q_itemsize, max_tile=4096):
    """Largest multiple-of-128 tile <= max_tile that fits the VMEM budget."""
    qt = min(max_tile, _round_up(q_len, 128))
    budget = 24 * 1024 * 1024   # double-buffered queue tiles + f32 logit slabs

    def cost(t):
        return 2 * t * d * q_itemsize + 2 * m_pad * t * 4

    while qt > 128 and cost(qt) > budget:
        qt -= 128
    return max(qt, 128)


def moco_loss(projected, predicted, queue, queue_ptr, *,
              temperature=0.2, reduction='mean', training=True,
              queue_tile=None):
    assert projected.ndim == 3 and predicted.ndim == 3
    assert reduction == 'mean'  # TODO(synk): only 'mean' reduction supported
    B, Vg, D = projected.shape
    Vp = predicted.shape[1]
    assert Vp >= Vg
    Vl = Vp - Vg
    Q, Dq = queue.shape
    assert Dq == D

    mm_dtype = queue.dtype                  # matmul runs in the queue's dtype
    q_item = jnp.dtype(mm_dtype).itemsize
    # Sublane pack of the matmul operand dtype: 8 (f32) / 16 (bf16) / 32 (i8).
    pack = 8 * max(1, 4 // q_item)
    m_rows = B * Vp
    m_pad = max(pack, _round_up(m_rows, pack))

    if queue_tile is None:
        queue_tile = _pick_queue_tile(Q, D, m_pad, q_item)
    assert queue_tile % 128 == 0
    n_tiles = pl.cdiv(Q, queue_tile)
    mask_tail = (n_tiles * queue_tile) != Q

    # Present predicted view-major (row = ii*B + b) and zero-padded to the
    # sublane pack so the kernel init is one contiguous (m_pad, D) write.
    pred_vm = jnp.transpose(predicted, (1, 0, 2)).reshape(m_rows, D)
    if m_pad > m_rows:
        pred_vm = jnp.pad(pred_vm, ((0, m_pad - m_rows), (0, 0)))

    kernel = functools.partial(
        _moco_kernel, temperature=float(temperature),
        num_global_views=Vg, num_local_views=Vl, batch=B,
        queue_len=Q, queue_tile=queue_tile, mask_tail=mask_tail)

    # Rough resident-VMEM estimate -> explicit scoped limit (raises the 16/32
    # MiB defaults on v5e/v6e, stays within v7x's 64 MiB physical VMEM).
    est = (2 * queue_tile * D * q_item                     # queue double-buffer
           + 2 * m_pad * queue_tile * 4                    # f32 logits + exp
           + m_pad * D * (q_item + 4 + 2 * predicted.dtype.itemsize)
           + 4 * B * Vg * D * 4                            # proj + proj_norm
           + m_pad * 128 * 4)                              # lane accumulator
    vmem_limit = int(min(64 * 1024 * 1024, max(32 * 1024 * 1024, 2 * est)))

    outs = pl.pallas_call(
        kernel,
        out_shape=(
            jax.ShapeDtypeStruct((B, Vg, D), projected.dtype),
            jax.ShapeDtypeStruct((B, 1), jnp.float32),
            jax.ShapeDtypeStruct((B, 1), jnp.float32),
            jax.ShapeDtypeStruct((B, 1), jnp.float32),
            jax.ShapeDtypeStruct((B, 1), jnp.float32),
        ),
        grid=(n_tiles,),
        in_specs=[
            pl.BlockSpec((B, Vg, D), lambda k: (0, 0, 0)),
            pl.BlockSpec((m_pad, D), lambda k: (0, 0)),
            pl.BlockSpec((queue_tile, D), lambda k: (k, 0)),
        ],
        out_specs=(
            pl.BlockSpec((B, Vg, D), lambda k: (0, 0, 0)),
            pl.BlockSpec((B, 1), lambda k: (0, 0)),
            pl.BlockSpec((B, 1), lambda k: (0, 0)),
            pl.BlockSpec((B, 1), lambda k: (0, 0)),
            pl.BlockSpec((B, 1), lambda k: (0, 0)),
        ),
        scratch_shapes=[
            pltpu.VMEM((m_pad, D), mm_dtype),     # pred_mm (MXU operand)
            pltpu.VMEM((m_pad, D), jnp.float32),  # normalized pred (f32)
            pltpu.VMEM((m_pad, 128), jnp.float32),  # lane-chunked exp sums
        ],
        compiler_params=pltpu.CompilerParams(
            dimension_semantics=("arbitrary",),
            vmem_limit_bytes=vmem_limit),
    )(projected, pred_vm, queue)

    proj_norm, gl, ga, ll, la = outs
    # Per-batch sums over pairs -> mean over batch == sum over pairs of means.
    g_sum = jnp.mean(gl[:, 0])
    ga_sum = jnp.mean(ga[:, 0])
    l_sum = jnp.mean(ll[:, 0])
    la_sum = jnp.mean(la[:, 0])

    num_g = Vg * (Vg - 1)
    num_l = Vl * Vg
    num_t = num_g + num_l

    total = (g_sum + l_sum) / num_t if num_t > 0 else jnp.float32(0.0)
    losses = dict(
        total=total,
        global_loss=g_sum / num_g if num_g > 0 else jnp.float32(0.0))
    infos = dict(
        global_alignment=ga_sum / num_g if num_g > 0 else jnp.float32(0.0))
    if num_l > 0:
        losses['local_loss'] = l_sum / num_l
        infos['local_alignment'] = la_sum / num_l

    # Queue enqueue (in-place side effect in PyTorch) done functionally with a
    # traced pointer, reusing the kernel's normalized `projected` output. The
    # queue stays in natural (Q, D) layout so no transpose is ever needed.
    new_queue, new_ptr = queue, queue_ptr
    if training:
        to_enqueue = proj_norm.reshape(B * Vg, D).astype(queue.dtype)
        ptr = queue_ptr[0].astype(jnp.int32)
        # TODO(synk): like the PyTorch original, no wrap-around when
        # ptr + B*Vg > Q (dynamic_update_slice clamps instead of erroring).
        new_queue = lax.dynamic_update_slice(queue, to_enqueue,
                                             (ptr, jnp.int32(0)))
        new_ptr = queue_ptr.at[0].set((ptr + B * Vg) % Q)

    return (losses, infos), (new_queue, new_ptr)


def _moco_loss_ref(projected, predicted, queue, temperature=0.2):
    """Pure-JAX reference mirroring the PyTorch forward (reduction='mean')."""
    proj = _l2_normalize(projected.astype(jnp.float32))
    pred = _l2_normalize(predicted.astype(jnp.float32))
    q = queue.astype(jnp.float32)
    Vg, Vp = proj.shape[1], pred.shape[1]
    Vl = Vp - Vg

    def _loss(p, d):
        pos = jnp.einsum('nc,nc->n', d, p)
        neg = jnp.einsum('nc,qc->nq', d, q)
        logits = jnp.concatenate([pos[:, None], neg], axis=1) / temperature
        logp = jax.nn.log_softmax(logits, axis=-1)
        loss = jnp.mean(-logp[:, 0])
        align = jnp.mean(jax.nn.softmax(logits, axis=-1)[:, 0])
        return loss, align

    g_l = g_a = 0.0
    for i in range(Vg):
        for ii in range(Vg):
            if i == ii:
                continue
            l, a = _loss(proj[:, i], pred[:, ii])
            g_l, g_a = g_l + l, g_a + a
    l_l = l_a = 0.0
    for i in range(Vg):
        for ii in range(Vl):
            l, a = _loss(proj[:, i], pred[:, ii])
            l_l, l_a = l_l + l, l_a + a
    num_g, num_l = Vg * (Vg - 1), Vl * Vg
    out = dict(
        total=(g_l + l_l) / (num_g + num_l),
        global_loss=g_l / num_g,
        global_alignment=g_a / num_g,
    )
    if num_l > 0:
        out['local_loss'] = l_l / num_l
        out['local_alignment'] = l_a / num_l
    return out


if __name__ == "__main__":
    key = jax.random.PRNGKey(0)
    k1, k2, k3, k4 = jax.random.split(key, 4)

    B, Vg, Vp, D, Q = 2, 2, 4, 128, 2048
    projected = jax.random.normal(k1, (B, Vg, D), dtype=jnp.float32)
    predicted = jax.random.normal(k2, (B, Vp, D), dtype=jnp.float32)
    queue = _l2_normalize(jax.random.normal(k3, (Q, D), dtype=jnp.float32))
    queue_ptr = jnp.zeros((1,), dtype=jnp.int32)

    # f32 run with the queue split into 4 tiles (exercises the tile-sum
    # accumulation across grid steps).
    (losses, infos), (new_queue, new_ptr) = moco_loss(
        projected, predicted, queue, queue_ptr,
        temperature=0.2, reduction='mean', training=True, queue_tile=512)
    jax.block_until_ready(losses['total'])
    jax.block_until_ready(new_queue)

    ref = _moco_loss_ref(projected, predicted, queue, temperature=0.2)
    np.testing.assert_allclose(np.asarray(losses['total']),
                               np.asarray(ref['total']), rtol=1e-4, atol=1e-4)
    np.testing.assert_allclose(np.asarray(losses['global_loss']),
                               np.asarray(ref['global_loss']), rtol=1e-4, atol=1e-4)
    np.testing.assert_allclose(np.asarray(losses['local_loss']),
                               np.asarray(ref['local_loss']), rtol=1e-4, atol=1e-4)
    np.testing.assert_allclose(np.asarray(infos['global_alignment']),
                               np.asarray(ref['global_alignment']), rtol=1e-4, atol=1e-4)
    np.testing.assert_allclose(np.asarray(infos['local_alignment']),
                               np.asarray(ref['local_alignment']), rtol=1e-4, atol=1e-4)

    # Enqueue path: normalized projected written at the (traced) pointer.
    np.testing.assert_allclose(
        np.asarray(new_queue[:B * Vg]),
        np.asarray(_l2_normalize(projected).reshape(B * Vg, D)),
        rtol=1e-5, atol=1e-5)
    assert int(new_ptr[0]) == (B * Vg) % Q

    # Non-divisible queue length: cdiv grid with a lane mask on the last tile.
    Q2 = 1920
    queue2 = _l2_normalize(jax.random.normal(k4, (Q2, D), dtype=jnp.float32))
    (losses2, _), _ = moco_loss(
        projected, predicted, queue2, queue_ptr,
        temperature=0.2, reduction='mean', training=False, queue_tile=512)
    jax.block_until_ready(losses2['total'])
    ref2 = _moco_loss_ref(projected, predicted, queue2, temperature=0.2)
    np.testing.assert_allclose(np.asarray(losses2['total']),
                               np.asarray(ref2['total']), rtol=1e-4, atol=1e-4)

    # bf16 queue/features path (native-rate MXU matmul, f32 accumulate):
    # default single-tile grid; loose tolerance vs the f32 reference.
    (losses_bf16, _), _ = moco_loss(
        projected.astype(jnp.bfloat16), predicted.astype(jnp.bfloat16),
        queue.astype(jnp.bfloat16), queue_ptr,
        temperature=0.2, reduction='mean', training=False)
    jax.block_until_ready(losses_bf16['total'])
    np.testing.assert_allclose(np.asarray(losses_bf16['total'], dtype=np.float32),
                               np.asarray(ref['total']), rtol=0.1)

    print("KERNEL_OK")
</pallas_src>

<mosaic_0001>
module attributes {stable_mosaic.version = 11 : i64} {
  func.func @_moco_kernel(%arg0: i32, %arg1: memref<2x2x128xf32, #tpu.memory_space<vmem>>, %arg2: memref<8x128xf32, #tpu.memory_space<vmem>>, %arg3: memref<512x128xf32, #tpu.memory_space<vmem>>, %arg4: memref<2x2x128xf32, #tpu.memory_space<vmem>>, %arg5: memref<2x1xf32, #tpu.memory_space<vmem>>, %arg6: memref<2x1xf32, #tpu.memory_space<vmem>>, %arg7: memref<2x1xf32, #tpu.memory_space<vmem>>, %arg8: memref<2x1xf32, #tpu.memory_space<vmem>>, %arg9: memref<8x128xf32, #tpu.memory_space<vmem>>, %arg10: memref<8x128xf32, #tpu.memory_space<vmem>>, %arg11: memref<8x128xf32, #tpu.memory_space<vmem>>) attributes {dimension_semantics = [#tpu.dimension_semantics<arbitrary>], iteration_bounds = array<i64: 4>, scalar_prefetch = 0 : i64, scratch_operands = 3 : i64, tpu.core_type = #tpu.core_type<tc>, window_params = [{pipeline_mode = #tpu.pipeline_mode<synchronous>, transform_indices = @transform_0, window_bounds = array<i64: 2, 2, 128>}, {pipeline_mode = #tpu.pipeline_mode<synchronous>, transform_indices = @transform_1, window_bounds = array<i64: 8, 128>}, {transform_indices = @transform_2, window_bounds = array<i64: 512, 128>}, {pipeline_mode = #tpu.pipeline_mode<synchronous>, transform_indices = @transform_3, window_bounds = array<i64: 2, 2, 128>}, {pipeline_mode = #tpu.pipeline_mode<synchronous>, transform_indices = @transform_4, window_bounds = array<i64: 2, 1>}, {pipeline_mode = #tpu.pipeline_mode<synchronous>, transform_indices = @transform_5, window_bounds = array<i64: 2, 1>}, {pipeline_mode = #tpu.pipeline_mode<synchronous>, transform_indices = @transform_6, window_bounds = array<i64: 2, 1>}, {pipeline_mode = #tpu.pipeline_mode<synchronous>, transform_indices = @transform_7, window_bounds = array<i64: 2, 1>}]} {
    %c0_i32 = arith.constant 0 : i32
    %0 = arith.cmpi eq, %arg0, %c0_i32 : i32
    %1 = arith.extui %0 : i1 to i32
    %cst = arith.constant 5.000000e+00 : f32
    %c0_i32_0 = arith.constant 0 : i32
    %2 = arith.cmpi ne, %1, %c0_i32_0 : i32
    scf.if %2 {
      %c0_12 = arith.constant 0 : index
      %c0_13 = arith.constant 0 : index
      %22 = vector.load %arg2[%c0_12, %c0_13] : memref<8x128xf32, #tpu.memory_space<vmem>>, vector<8x128xf32>
      %23 = arith.mulf %22, %22 : vector<8x128xf32>
      %cst_14 = arith.constant dense<0.000000e+00> : vector<8xf32>
      %24 = vector.multi_reduction <add>, %23, %cst_14 [1] : vector<8x128xf32> to vector<8xf32>
      %25 = vector.shape_cast %24 : vector<8xf32> to vector<8x1xf32>
      %cst_15 = arith.constant 1.000000e-24 : f32
      %26 = vector.broadcast %cst_15 : f32 to vector<8x1xf32>
      %27 = arith.maximumf %25, %26 : vector<8x1xf32>
      %28 = math.rsqrt %27 : vector<8x1xf32>
      %29 = vector.broadcast %28 : vector<8x1xf32> to vector<8x128xf32>
      %30 = arith.mulf %22, %29 : vector<8x128xf32>
      %c0_16 = arith.constant 0 : index
      %c0_17 = arith.constant 0 : index
      %31 = vector.load %arg10[%c0_16, %c0_17] : memref<8x128xf32, #tpu.memory_space<vmem>>, vector<8x128xf32>
      tpu.vector_store %arg10[%c0_16, %c0_17], %30 {strides = array<i32>} : memref<8x128xf32, #tpu.memory_space<vmem>>, vector<8x128xf32>,
      %32 = vector.broadcast %cst : f32 to vector<8x128xf32>
      %33 = arith.mulf %30, %32 : vector<8x128xf32>
      %c0_18 = arith.constant 0 : index
      %c0_19 = arith.constant 0 : index
      %34 = vector.load %arg9[%c0_18, %c0_19] : memref<8x128xf32, #tpu.memory_space<vmem>>, vector<8x128xf32>
      tpu.vector_store %arg9[%c0_18, %c0_19], %33 {strides = array<i32>} : memref<8x128xf32, #tpu.memory_space<vmem>>, vector<8x128xf32>,
      %cst_20 = arith.constant 0.000000e+00 : f32
      %35 = vector.broadcast %cst_20 : f32 to vector<8x128xf32>
      %c0_21 = arith.constant 0 : index
      %c0_22 = arith.constant 0 : index
      %36 = vector.load %arg11[%c0_21, %c0_22] : memref<8x128xf32, #tpu.memory_space<vmem>>, vector<8x128xf32>
      tpu.vector_store %arg11[%c0_21, %c0_22], %35 {strides = array<i32>} : memref<8x128xf32, #tpu.memory_space<vmem>>, vector<8x128xf32>,
    } else {
    }
    %c0 = arith.constant 0 : index
    %c0_1 = arith.constant 0 : index
    %3 = vector.load %arg9[%c0, %c0_1] : memref<8x128xf32, #tpu.memory_space<vmem>>, vector<8x128xf32>
    %c0_2 = arith.constant 0 : index
    %c0_3 = arith.constant 0 : index
    %4 = vector.load %arg3[%c0_2, %c0_3] : memref<512x128xf32, #tpu.memory_space<vmem>>, vector<512x128xf32>
    %cst_4 = arith.constant dense<0.000000e+00> : vector<8x512xf32>
    %5 = tpu.matmul %3, %4, %cst_4 {dimension_numbers = #tpu.dot_dimension_numbers<[1], [1], [0], [0], [0, 0, 1, 0], [], []>} : vector<8x128xf32>, vector<512x128xf32>, vector<8x512xf32> -> vector<8x512xf32>
    %cst_5 = arith.constant 5.000000e+00 : f32
    %6 = vector.broadcast %cst_5 : f32 to vector<8x512xf32>
    %7 = arith.subf %5, %6 : vector<8x512xf32>
    %8 = math.exp %7 : vector<8x512xf32>
    %9 = vector.extract_strided_slice %8 {offsets = [0, 0], sizes = [8, 128], strides = [1, 1]} : vector<8x512xf32> to vector<8x128xf32>
    %10 = vector.extract_strided_slice %8 {offsets = [0, 128], sizes = [8, 128], strides = [1, 1]} : vector<8x512xf32> to vector<8x128xf32>
    %11 = arith.addf %9, %10 : vector<8x128xf32>
    %12 = vector.extract_strided_slice %8 {offsets = [0, 256], sizes = [8, 128], strides = [1, 1]} : vector<8x512xf32> to vector<8x128xf32>
    %13 = arith.addf %11, %12 : vector<8x128xf32>
    %14 = vector.extract_strided_slice %8 {offsets = [0, 384], sizes = [8, 128], strides = [1, 1]} : vector<8x512xf32> to vector<8x128xf32>
    %15 = arith.addf %13, %14 : vector<8x128xf32>
    %c0_6 = arith.constant 0 : index
    %c0_7 = arith.constant 0 : index
    %16 = vector.load %arg11[%c0_6, %c0_7] : memref<8x128xf32, #tpu.memory_space<vmem>>, vector<8x128xf32>
    %17 = arith.addf %16, %15 : vector<8x128xf32>
    %c0_8 = arith.constant 0 : index
    %c0_9 = arith.constant 0 : index
    %18 = vector.load %arg11[%c0_8, %c0_9] : memref<8x128xf32, #tpu.memory_space<vmem>>, vector<8x128xf32>
    tpu.vector_store %arg11[%c0_8, %c0_9], %17 {strides = array<i32>} : memref<8x128xf32, #tpu.memory_space<vmem>>, vector<8x128xf32>,
    %c3_i32 = arith.constant 3 : i32
    %19 = arith.cmpi eq, %arg0, %c3_i32 : i32
    %20 = arith.extui %19 : i1 to i32
    %cst_10 = arith.constant 5.000000e+00 : f32
    %c0_i32_11 = arith.constant 0 : i32
    %21 = arith.cmpi ne, %20, %c0_i32_11 : i32
    scf.if %21 {
      %c0_12 = arith.constant 0 : index
      %c0_13 = arith.constant 0 : index
      %c0_14 = arith.constant 0 : index
      %22 = vector.load %arg1[%c0_12, %c0_13, %c0_14] : memref<2x2x128xf32, #tpu.memory_space<vmem>>, vector<2x2x128xf32>
      %23 = arith.mulf %22, %22 : vector<2x2x128xf32>
      %cst_15 = arith.constant dense<0.000000e+00> : vector<2x2xf32>
      %24 = vector.multi_reduction <add>, %23, %cst_15 [2] : vector<2x2x128xf32> to vector<2x2xf32>
      %25 = vector.shape_cast %24 : vector<2x2xf32> to vector<2x2x1xf32>
      %cst_16 = arith.constant 1.000000e-24 : f32
      %26 = vector.broadcast %cst_16 : f32 to vector<2x2x1xf32>
      %27 = arith.maximumf %25, %26 : vector<2x2x1xf32>
      %28 = math.rsqrt %27 : vector<2x2x1xf32>
      %29 = vector.broadcast %28 : vector<2x2x1xf32> to vector<2x2x128xf32>
      %30 = arith.mulf %22, %29 : vector<2x2x128xf32>
      %c0_17 = arith.constant 0 : index
      %c0_18 = arith.constant 0 : index
      %c0_19 = arith.constant 0 : index
      %31 = vector.load %arg4[%c0_17, %c0_18, %c0_19] : memref<2x2x128xf32, #tpu.memory_space<vmem>>, vector<2x2x128xf32>
      tpu.vector_store %arg4[%c0_17, %c0_18, %c0_19], %30 {strides = array<i32>} : memref<2x2x128xf32, #tpu.memory_space<vmem>>, vector<2x2x128xf32>,
      %c0_20 = arith.constant 0 : index
      %c0_21 = arith.constant 0 : index
      %32 = vector.load %arg10[%c0_20, %c0_21] : memref<8x128xf32, #tpu.memory_space<vmem>>, vector<8x128xf32>
      %c0_22 = arith.constant 0 : index
      %c0_23 = arith.constant 0 : index
      %33 = vector.load %arg11[%c0_22, %c0_23] : memref<8x128xf32, #tpu.memory_space<vmem>>, vector<8x128xf32>
      %cst_24 = arith.constant dense<0.000000e+00> : vector<8xf32>
      %34 = vector.multi_reduction <add>, %33, %cst_24 [1] : vector<8x128xf32> to vector<8xf32>
      %35 = vector.shape_cast %34 : vector<8xf32> to vector<8x1xf32>
      %cst_25 = arith.constant 0.000000e+00 : f32
      %36 = vector.broadcast %cst_25 : f32 to vector<2x1xf32>
      %37 = vector.extract_strided_slice %32 {offsets = [2, 0], sizes = [2, 128], strides = [1, 1]} : vector<8x128xf32> to vector<2x128xf32>
      %38 = vector.extract_strided_slice %30 {offsets = [0, 0, 0], sizes = [2, 1, 128], strides = [1, 1, 1]} : vector<2x2x128xf32> to vector<2x1x128xf32>
      %39 = vector.shape_cast %38 : vector<2x1x128xf32> to vector<2x128xf32>
      %40 = arith.mulf %37, %39 : vector<2x128xf32>
      %cst_26 = arith.constant dense<0.000000e+00> : vector<2xf32>
      %41 = vector.multi_reduction <add>, %40, %cst_26 [1] : vector<2x128xf32> to vector<2xf32>
      %42 = vector.shape_cast %41 : vector<2xf32> to vector<2x1xf32>
      %43 = vector.broadcast %cst_10 : f32 to vector<2x1xf32>
      %44 = arith.mulf %42, %43 : vector<2x1xf32>
      %45 = vector.extract_strided_slice %35 {offsets = [2, 0], sizes = [2, 1], strides = [1, 1]} : vector<8x1xf32> to vector<2x1xf32>
      %46 = vector.broadcast %cst_10 : f32 to vector<2x1xf32>
      %47 = arith.subf %44, %46 : vector<2x1xf32>
      %48 = math.exp %47 : vector<2x1xf32>
      %49 = arith.addf %48, %45 : vector<2x1xf32>
      %50 = math.log %49 : vector<2x1xf32>
      %51 = vector.broadcast %cst_10 : f32 to vector<2x1xf32>
      %52 = arith.addf %51, %50 : vector<2x1xf32>
      %53 = arith.subf %52, %44 : vector<2x1xf32>
      %54 = arith.subf %44, %52 : vector<2x1xf32>
      %55 = math.exp %54 : vector<2x1xf32>
      %56 = arith.addf %36, %53 : vector<2x1xf32>
      %57 = arith.addf %36, %55 : vector<2x1xf32>
      %58 = vector.extract_strided_slice %32 {offsets = [0, 0], sizes = [2, 128], strides = [1, 1]} : vector<8x128xf32> to vector<2x128xf32>
      %59 = vector.extract_strided_slice %30 {offsets = [0, 1, 0], sizes = [2, 1, 128], strides = [1, 1, 1]} : vector<2x2x128xf32> to vector<2x1x128xf32>
      %60 = vector.shape_cast %59 : vector<2x1x128xf32> to vector<2x128xf32>
      %61 = arith.mulf %58, %60 : vector<2x128xf32>
      %cst_27 = arith.constant dense<0.000000e+00> : vector<2xf32>
      %62 = vector.multi_reduction <add>, %61, %cst_27 [1] : vector<2x128xf32> to vector<2xf32>
      %63 = vector.shape_cast %62 : vector<2xf32> to vector<2x1xf32>
      %64 = vector.broadcast %cst_10 : f32 to vector<2x1xf32>
      %65 = arith.mulf %63, %64 : vector<2x1xf32>
      %66 = vector.extract_strided_slice %35 {offsets = [0, 0], sizes = [2, 1], strides = [1, 1]} : vector<8x1xf32> to vector<2x1xf32>
      %67 = vector.broadcast %cst_10 : f32 to vector<2x1xf32>
      %68 = arith.subf %65, %67 : vector<2x1xf32>
      %69 = math.exp %68 : vector<2x1xf32>
      %70 = arith.addf %69, %66 : vector<2x1xf32>
      %71 = math.log %70 : vector<2x1xf32>
      %72 = vector.broadcast %cst_10 : f32 to vector<2x1xf32>
      %73 = arith.addf %72, %71 : vector<2x1xf32>
      %74 = arith.subf %73, %65 : vector<2x1xf32>
      %75 = arith.subf %65, %73 : vector<2x1xf32>
      %76 = math.exp %75 : vector<2x1xf32>
      %77 = arith.addf %56, %74 : vector<2x1xf32>
      %78 = arith.addf %57, %76 : vector<2x1xf32>
      %79 = vector.extract_strided_slice %32 {offsets = [0, 0], sizes = [2, 128], strides = [1, 1]} : vector<8x128xf32> to vector<2x128xf32>
      %80 = vector.extract_strided_slice %30 {offsets = [0, 0, 0], sizes = [2, 1, 128], strides = [1, 1, 1]} : vector<2x2x128xf32> to vector<2x1x128xf32>
      %81 = vector.shape_cast %80 : vector<2x1x128xf32> to vector<2x128xf32>
      %82 = arith.mulf %79, %81 : vector<2x128xf32>
      %cst_28 = arith.constant dense<0.000000e+00> : vector<2xf32>
      %83 = vector.multi_reduction <add>, %82, %cst_28 [1] : vector<2x128xf32> to vector<2xf32>
      %84 = vector.shape_cast %83 : vector<2xf32> to vector<2x1xf32>
      %85 = vector.broadcast %cst_10 : f32 to vector<2x1xf32>
      %86 = arith.mulf %84, %85 : vector<2x1xf32>
      %87 = vector.extract_strided_slice %35 {offsets = [0, 0], sizes = [2, 1], strides = [1, 1]} : vector<8x1xf32> to vector<2x1xf32>
      %88 = vector.broadcast %cst_10 : f32 to vector<2x1xf32>
      %89 = arith.subf %86, %88 : vector<2x1xf32>
      %90 = math.exp %89 : vector<2x1xf32>
      %91 = arith.addf %90, %87 : vector<2x1xf32>
      %92 = math.log %91 : vector<2x1xf32>
      %93 = vector.broadcast %cst_10 : f32 to vector<2x1xf32>
      %94 = arith.addf %93, %92 : vector<2x1xf32>
      %95 = arith.subf %94, %86 : vector<2x1xf32>
      %96 = arith.subf %86, %94 : vector<2x1xf32>
      %97 = math.exp %96 : vector<2x1xf32>
      %98 = arith.addf %36, %95 : vector<2x1xf32>
      %99 = arith.addf %36, %97 : vector<2x1xf32>
      %100 = vector.extract_strided_slice %32 {offsets = [2, 0], sizes = [2, 128], strides = [1, 1]} : vector<8x128xf32> to vector<2x128xf32>
      %101 = vector.extract_strided_slice %30 {offsets = [0, 0, 0], sizes = [2, 1, 128], strides = [1, 1, 1]} : vector<2x2x128xf32> to vector<2x1x128xf32>
      %102 = vector.shape_cast %101 : vector<2x1x128xf32> to vector<2x128xf32>
      %103 = arith.mulf %100, %102 : vector<2x128xf32>
      %cst_29 = arith.constant dense<0.000000e+00> : vector<2xf32>
      %104 = vector.multi_reduction <add>, %103, %cst_29 [1] : vector<2x128xf32> to vector<2xf32>
      %105 = vector.shape_cast %104 : vector<2xf32> to vector<2x1xf32>
      %106 = vector.broadcast %cst_10 : f32 to vector<2x1xf32>
      %107 = arith.mulf %105, %106 : vector<2x1xf32>
      %108 = vector.extract_strided_slice %35 {offsets = [2, 0], sizes = [2, 1], strides = [1, 1]} : vector<8x1xf32> to vector<2x1xf32>
      %109 = vector.broadcast %cst_10 : f32 to vector<2x1xf32>
      %110 = arith.subf %107, %109 : vector<2x1xf32>
      %111 = math.exp %110 : vector<2x1xf32>
      %112 = arith.addf %111, %108 : vector<2x1xf32>
      %113 = math.log %112 : vector<2x1xf32>
      %114 = vector.broadcast %cst_10 : f32 to vector<2x1xf32>
      %115 = arith.addf %114, %113 : vector<2x1xf32>
      %116 = arith.subf %115, %107 : vector<2x1xf32>
      %117 = arith.subf %107, %115 : vector<2x1xf32>
      %118 = math.exp %117 : vector<2x1xf32>
      %119 = arith.addf %98, %116 : vector<2x1xf32>
      %120 = arith.addf %99, %118 : vector<2x1xf32>
      %121 = vector.extract_strided_slice %32 {offsets = [0, 0], sizes = [2, 128], strides = [1, 1]} : vector<8x128xf32> to vector<2x128xf32>
      %122 = vector.extract_strided_slice %30 {offsets = [0, 1, 0], sizes = [2, 1, 128], strides = [1, 1, 1]} : vector<2x2x128xf32> to vector<2x1x128xf32>
      %123 = vector.shape_cast %122 : vector<2x1x128xf32> to vector<2x128xf32>
      %124 = arith.mulf %121, %123 : vector<2x128xf32>
      %cst_30 = arith.constant dense<0.000000e+00> : vector<2xf32>
      %125 = vector.multi_reduction <add>, %124, %cst_30 [1] : vector<2x128xf32> to vector<2xf32>
      %126 = vector.shape_cast %125 : vector<2xf32> to vector<2x1xf32>
      %127 = vector.broadcast %cst_10 : f32 to vector<2x1xf32>
      %128 = arith.mulf %126, %127 : vector<2x1xf32>
      %129 = vector.extract_strided_slice %35 {offsets = [0, 0], sizes = [2, 1], strides = [1, 1]} : vector<8x1xf32> to vector<2x1xf32>
      %130 = vector.broadcast %cst_10 : f32 to vector<2x1xf32>
      %131 = arith.subf %128, %130 : vector<2x1xf32>
      %132 = math.exp %131 : vector<2x1xf32>
      %133 = arith.addf %132, %129 : vector<2x1xf32>
      %134 = math.log %133 : vector<2x1xf32>
      %135 = vector.broadcast %cst_10 : f32 to vector<2x1xf32>
      %136 = arith.addf %135, %134 : vector<2x1xf32>
      %137 = arith.subf %136, %128 : vector<2x1xf32>
      %138 = arith.subf %128, %136 : vector<2x1xf32>
      %139 = math.exp %138 : vector<2x1xf32>
      %140 = arith.addf %119, %137 : vector<2x1xf32>
      %141 = arith.addf %120, %139 : vector<2x1xf32>
      %142 = vector.extract_strided_slice %32 {offsets = [2, 0], sizes = [2, 128], strides = [1, 1]} : vector<8x128xf32> to vector<2x128xf32>
      %143 = vector.extract_strided_slice %30 {offsets = [0, 1, 0], sizes = [2, 1, 128], strides = [1, 1, 1]} : vector<2x2x128xf32> to vector<2x1x128xf32>
      %144 = vector.shape_cast %143 : vector<2x1x128xf32> to vector<2x128xf32>
      %145 = arith.mulf %142, %144 : vector<2x128xf32>
      %cst_31 = arith.constant dense<0.000000e+00> : vector<2xf32>
      %146 = vector.multi_reduction <add>, %145, %cst_31 [1] : vector<2x128xf32> to vector<2xf32>
      %147 = vector.shape_cast %146 : vector<2xf32> to vector<2x1xf32>
      %148 = vector.broadcast %cst_10 : f32 to vector<2x1xf32>
      %149 = arith.mulf %147, %148 : vector<2x1xf32>
      %150 = vector.extract_strided_slice %35 {offsets = [2, 0], sizes = [2, 1], strides = [1, 1]} : vector<8x1xf32> to vector<2x1xf32>
      %151 = vector.broadcast %cst_10 : f32 to vector<2x1xf32>
      %152 = arith.subf %149, %151 : vector<2x1xf32>
      %153 = math.exp %152 : vector<2x1xf32>
      %154 = arith.addf %153, %150 : vector<2x1xf32>
      %155 = math.log %154 : vector<2x1xf32>
      %156 = vector.broadcast %cst_10 : f32 to vector<2x1xf32>
      %157 = arith.addf %156, %155 : vector<2x1xf32>
      %158 = arith.subf %157, %149 : vector<2x1xf32>
      %159 = arith.subf %149, %157 : vector<2x1xf32>
      %160 = math.exp %159 : vector<2x1xf32>
      %161 = arith.addf %140, %158 : vector<2x1xf32>
      %162 = arith.addf %141, %160 : vector<2x1xf32>
      %c0_32 = arith.constant 0 : index
      %c0_33 = arith.constant 0 : index
      %163 = vector.load %arg5[%c0_32, %c0_33] : memref<2x1xf32, #tpu.memory_space<vmem>>, vector<2x1xf32>
      tpu.vector_store %arg5[%c0_32, %c0_33], %77 {strides = array<i32>} : memref<2x1xf32, #tpu.memory_space<vmem>>, vector<2x1xf32>,
      %c0_34 = arith.constant 0 : index
      %c0_35 = arith.constant 0 : index
      %164 = vector.load %arg6[%c0_34, %c0_35] : memref<2x1xf32, #tpu.memory_space<vmem>>, vector<2x1xf32>
      tpu.vector_store %arg6[%c0_34, %c0_35], %78 {strides = array<i32>} : memref<2x1xf32, #tpu.memory_space<vmem>>, vector<2x1xf32>,
      %c0_36 = arith.constant 0 : index
      %c0_37 = arith.constant 0 : index
      %165 = vector.load %arg7[%c0_36, %c0_37] : memref<2x1xf32, #tpu.memory_space<vmem>>, vector<2x1xf32>
      tpu.vector_store %arg7[%c0_36, %c0_37], %161 {strides = array<i32>} : memref<2x1xf32, #tpu.memory_space<vmem>>, vector<2x1xf32>,
      %c0_38 = arith.constant 0 : index
      %c0_39 = arith.constant 0 : index
      %166 = vector.load %arg8[%c0_38, %c0_39] : memref<2x1xf32, #tpu.memory_space<vmem>>, vector<2x1xf32>
      tpu.vector_store %arg8[%c0_38, %c0_39], %162 {strides = array<i32>} : memref<2x1xf32, #tpu.memory_space<vmem>>, vector<2x1xf32>,
    } else {
    }
    return
  }
  func.func @transform_0(%arg0: i32) -> (i32, i32, i32) {
    %c0_i32 = arith.constant 0 : i32
    %c0_i32_0 = arith.constant 0 : i32
    %c0_i32_1 = arith.constant 0 : i32
    %c0_i32_2 = arith.constant 0 : i32
    return %c0_i32, %c0_i32_0, %c0_i32_1 : i32, i32, i32
  }
  func.func @transform_1(%arg0: i32) -> (i32, i32) {
    %c0_i32 = arith.constant 0 : i32
    %c0_i32_0 = arith.constant 0 : i32
    %c0_i32_1 = arith.constant 0 : i32
    return %c0_i32, %c0_i32_0 : i32, i32
  }
  func.func @transform_2(%arg0: i32) -> (i32, i32) {
    %c0_i32 = arith.constant 0 : i32
    %c0_i32_0 = arith.constant 0 : i32
    return %arg0, %c0_i32 : i32, i32
  }
  func.func @transform_3(%arg0: i32) -> (i32, i32, i32) {
    %c0_i32 = arith.constant 0 : i32
    %c0_i32_0 = arith.constant 0 : i32
    %c0_i32_1 = arith.constant 0 : i32
    %c0_i32_2 = arith.constant 0 : i32
    return %c0_i32, %c0_i32_0, %c0_i32_1 : i32, i32, i32
  }
  func.func @transform_4(%arg0: i32) -> (i32, i32) {
    %c0_i32 = arith.constant 0 : i32
    %c0_i32_0 = arith.constant 0 : i32
    %c0_i32_1 = arith.constant 0 : i32
    return %c0_i32, %c0_i32_0 : i32, i32
  }
  func.func @transform_5(%arg0: i32) -> (i32, i32) {
    %c0_i32 = arith.constant 0 : i32
    %c0_i32_0 = arith.constant 0 : i32
    %c0_i32_1 = arith.constant 0 : i32
    return %c0_i32, %c0_i32_0 : i32, i32
  }
  func.func @transform_6(%arg0: i32) -> (i32, i32) {
    %c0_i32 = arith.constant 0 : i32
    %c0_i32_0 = arith.constant 0 : i32
    %c0_i32_1 = arith.constant 0 : i32
    return %c0_i32, %c0_i32_0 : i32, i32
  }
  func.func @transform_7(%arg0: i32) -> (i32, i32) {
    %c0_i32 = arith.constant 0 : i32
    %c0_i32_0 = arith.constant 0 : i32
    %c0_i32_1 = arith.constant 0 : i32
    return %c0_i32, %c0_i32_0 : i32, i32
  }
}

</mosaic_0001>

<bundles_post_ra>
// kernel: tpu_custom_call.1
= control target key start
LH: loop header
LB: loop body
LE: loop exit
PB: predicated region body
PF: predicated region fallthrough
CT: control target
= control target key end

     0   :  { %13 = vsyncpa [#allocation6], 0  ;;  %s1319_s0 = inlined_call_operand.hbm [shape: f32[2,2,128], index: 0, kind: input, shape index: {}]   ;;  %s1320_s1 = inlined_call_operand.hbm [shape: f32[8,128], index: 1, kind: input, shape index: {}]   ;;  %s1321_s2 = inlined_call_operand.hbm [shape: f32[2048,128], index: 2, kind: input, shape index: {}]   ;;  %s1322_s3 = inlined_call_operand.hbm [shape: f32[2,2,128], index: 3, kind: output, shape index: {0}]   ;;  %s1323_s4 = inlined_call_operand.vmem [shape: f32[2,1], index: 4, kind: output, shape index: {1}]   ;;  %s1324_s5 = inlined_call_operand.vmem [shape: f32[2,1], index: 5, kind: output, shape index: {2}]   ;;  %s1325_s6 = inlined_call_operand.vmem [shape: f32[2,1], index: 6, kind: output, shape index: {3}]   ;;  %s1326_s7 = inlined_call_operand.vmem [shape: f32[2,1], index: 7, kind: output, shape index: {4}]  }
   0x1   :  { %14 = vsyncpa [#allocation9], 0 }
   0x2   :  { %15 = vsyncpa [#allocation7], 0  ;;  %s1116_s24 = smov 0   ;;  %s1118_s25 = smov 0  }
   0x3   :  { %s1120_s26 = smov 0   ;;  %s1122_s27 = smov 0  }
   0x4 LB: > { %s1135_s28 = sadd.s32 4294967295, %s1064_s27   ;;  %p83_p0 = scmp.ne.s32.totalorder %s1056_s25, %s1052_s24  ;;  %s1064_s27 = sphi %s1122_s27, %s1334_s27   ;;  %s1060_s26 = sphi %s1120_s26, %s1333_s26   ;;  %s1056_s25 = sphi %s1118_s25, %s1332_s25   ;;  %s1052_s24 = sphi %s1116_s24, %s1331_s24  }
   0x5   : > { %p84_p1 = scmp.eq.s32.totalorder %s1135_s28, 0  ;;  %p762_p2 = scmp.ge.s32.totalorder %s1064_s27, 1 }
   0x6   : > { %p199_p3 = scmp.lt.s32.totalorder %s1064_s27, 5  ;;  %p763_p4 = scmp.ne.s32.totalorder %s1135_s28, 0 }
   0x7   : > { %p1144_p5 = por %p84_p1, %p83_p0  ;;  %s210_s9 = sshll.u32 %s1319_s0, 4  ;;  %s211_s9 = int_to_ptr.hbm [resolvable:$true] %s210_s9 }
   0x8   : > { %p1151_p6 = pnand %p762_p2, %p199_p3  ;;  %s1066_s11 = smov [#allocation5]  }
   0x9   : > { %s212_s12 = sshll.u32 %s1066_s11, 4  ;;  %s225_s15 = sshll.u32 %s1320_s1, 4  ;;  %s213_s12 = int_to_ptr.vmem [resolvable:$true] %s212_s12  ;;  %s226_s15 = int_to_ptr.hbm [resolvable:$true] %s225_s15 }
   0xa   : > { %p802_p7 = pneg %p1151_p6  ;;  %s1067_s16 = smov 32  }
   0xb   : > { %s1068_s17 = smov 2   ;;  %s1069_s18 = smov [#allocation8]  }
   0xc   : > { %p803_p8 = pnand %p802_p7, %p84_p1  ;;  %s227_s19 = sshll.u32 %s1069_s18, 4  ;;  %s228_s19 = int_to_ptr.vmem [resolvable:$true] %s227_s19 }
   0xd   : > { %s1163_s20 = sadd.s32 1, %s1064_s27   ;;  %s70_s21 = sadd.s32 1, %s1060_s26 }
   0xe   : > { %805 = dma.hbm_to_vmem [thread:$0]  (!%p803_p8), %s211_s9, 64, %s213_s12, [#allocation6], %s1067_s16, %s1067_s16, %s1068_s17  }
   0xf   : > { %808 = dma.hbm_to_vmem [thread:$0]  (!%p803_p8), %s226_s15, 128, %s228_s19, [#allocation9]  }
  0x10   : > { %s67_s22 = ssub.s32 %s1064_s27, %s1163_s20  ;;  %p77_p9 = scmp.ne.s32.totalorder %s1060_s26, %s1056_s25 }
  0x11   : > { %p68_p10 = scmp.eq.s32.totalorder %s67_s22, 0  ;;  %p78_p11 = scmp.eq.s32.totalorder %s1064_s27, 0 }
  0x12   : > { %p815_p12 = scmp.lt.s32.totalorder %s1064_s27, 4  ;;  %s238_s23 = sand.u32 1, %s1064_s27  }
  0x13   : > { %s1174_s24 = scalar_select %p68_p10, %s1060_s26, %s70_s21  }
  0x14   : > { %p79_p13 = por %p78_p11, %p77_p9  ;;  %s240_s30 = sand.u32 1, %s1060_s26  }
  0x15   : > { %s787_s8 = sshll.u32 %s1064_s27, 9  ;;  %s766_s9 = sshll.u32 %s240_s30, 9 }
  0x16   : > { %s247_s13 = scalar_lea.hbm %s1321_s2, %s787_s8  ;;  %s242_s15 = scalar_lea.vmem [#allocation10], %s766_s9 }
  0x17   : > { %s248_s14 = sshll.u32 %s247_s13, 4  ;;  %s250_s16 = sshll.u32 %s242_s15, 4  ;;  %s249_s14 = int_to_ptr.hbm [resolvable:$true] %s248_s14  ;;  %s251_s16 = int_to_ptr.vmem [resolvable:$true] %s250_s16 }
  0x18   : > { %p1183_p0 = pnand %p815_p12, %p79_p13  ;;  %s239_s18 = scalar_lea.sflag [#allocation6], %s238_s23 }
  0x19   : > { %s960_s19 = sshra.s32 %s249_s14, 4  ;;  %s967_s8 = scalar_lea.hbm %s1321_s2, 2048  ;;  %s961_s19 = int_to_ptr.hbm [resolvable:$true] %s960_s19 }
  0x1a   : > { %s962_s21 = scalar_lea.hbm %s961_s19, 512  ;;  %p964_p3 = pneg %p1183_p0 }
  0x1b   : > { %p963_p2 = scmp.ne.s32.totalorder %s961_s19, %s962_s21  ;;  %p968_p9 = scmp.lt.s32.totalorder %s961_s19, %s1321_s2 }
  0x1c   : > { %p969_p10 = scmp.lt.s32.totalorder %s967_s8, %s962_s21 }
  0x1d   : > { %p965_p7 = pnand %p964_p3, %p963_p2 }
  0x1e   : > { %p970_p11 = por %p969_p10, %p968_p9 }
  0x1f   : > { %p966_p8 = pneg %p965_p7 }
  0x21   : > { %p971_p12 = pnand %p970_p11, %p966_p8 }
  0x23   : > { %974 = shalt.err (!%p971_p12)
}
  0x24   : > { %s1070_s23 = smov 128   ;;  %s1071_s11 = smov 8  }
  0x25   : > { %812 = dma.hbm_to_vmem [thread:$0]  (!%p1183_p0), %s249_s14, 8192, %s251_s16, %s239_s18, %s1070_s23, %s1070_s23, %s1071_s11  }
  0x26   : > { %262 = sbr.rel (%p1151_p6) target bundleno = 743 (0x2e7), region = 32 }
  0x2b   : > { %1035 = dma.done.wait (%p84_p1), [#allocation6], 64  }
  0x2c   : > { %1037 = vsyncadd (%p84_p1), [#allocation6], 4294967232 }
  0x2d   : > { %1039 = dma.done.wait (%p84_p1), [#allocation9], 128  }
  0x2e   : > { %1041 = vsyncadd (%p84_p1), [#allocation9], 4294967168  ;;  %s274_s12 = sand.u32 1, %s1135_s28   ;;  %s276_s13 = sand.u32 1, %s1056_s25  }
  0x2f   : > { %s772_s14 = sshll.u32 %s276_s13, 9  ;;  %s275_s10 = scalar_lea.sflag [#allocation6], %s274_s12 }
  0x30   : > { %s1209_s15 = scalar_lea.vmem [#allocation10], %s772_s14 }
  0x31   : > { %1043 = dma.done.wait (%p1144_p5), %s275_s10, 8192  }
  0x32   : > { %1045 = vsyncadd (%p1144_p5), %s275_s10, 4294959104  ;;  %309 = sbr.rel (%p763_p4) target bundleno = 199 (0xc7), region = 48 }
  0x37   : > { %v310_v0 = vld [vmem:[#allocation8] sm:$0xff]  ;;  %v1072_v2 = vmov 0.0  }
  0x38   : > { %v311_v1 = vmul.f32 %v310_v0, %v310_v0  ;;  %329 = vst [vmem:[#allocation4] sm:$0xff] %v1072_v2 }
  0x3a   : > { %312 = vadd.xlane.f32.xlu0 %v311_v1 }
  0xad   : > { %v313_v3 = vpop.xlane.xlu0 %312 }
  0xae   : > { %v314_v4 = vmax.f32 %v313_v3, 1e-24 }
  0xb0   : > { %862 = vrsqrt.f32 %v314_v4  ;;  %vm321_vm1 = vweird.f32 %v314_v4 }
  0xb6   : > { %v863_v5 = vpop.eup %862 }
  0xb7   : > { %v316_v6 = vmul.f32 %v863_v5, %v314_v4  ;;  %vm322_vm0 = vweird.f32 %v863_v5 }
  0xb8   : > { %vm323_vm2 = vmor %vm321_vm1, %vm322_vm0 }
  0xb9   : > { %v317_v7 = vmul.f32 %v863_v5, %v316_v6 }
  0xbb   : > { %v318_v8 = vmul.f32 0.5, %v317_v7 }
  0xbd   : > { %v319_v9 = vsub.f32 1.5, %v318_v8 }
  0xbf   : > { %v320_v10 = vmul.f32 %v863_v5, %v319_v9 }
  0xc1   : > { %v324_v11 = vsel %vm323_vm2, %v863_v5, %v320_v10 }
  0xc2   : > { %v325_v12 = vmul.f32 %v324_v11, %v310_v0 }
  0xc4   : > { %326 = vst [vmem:[#allocation3] sm:$0xff] %v325_v12  ;;  %v327_v13 = vmul.f32 5.0, %v325_v12 }
  0xc6   : > { %328 = vst [vmem:[#allocation2] sm:$0xff] %v327_v13 }
  0xc7 PF: > { %v378_v14 = vld [vmem:[%s1209_s15 + $0x178] sm:$0xff]  ;;  %v377_v18 = vld [vmem:[%s1209_s15 + $0x170] sm:$0xff]  ;;  %v376_v22 = vld [vmem:[%s1209_s15 + $0x168] sm:$0xff]  ;;  %p778_p1 = scmp.ne.s32.totalorder %s1135_s28, 3 }
  0xc8   : > { %v394_v15 = vld [vmem:[%s1209_s15 + $0x1f8] sm:$0xff]  ;;  %435 = vmatpush.xpose.msra.mxu2 %v378_v14  ;;  %v393_v19 = vld [vmem:[%s1209_s15 + $0x1f0] sm:$0xff]  ;;  %v392_v23 = vld [vmem:[%s1209_s15 + $0x1e8] sm:$0xff] }
  0xc9   : > { %v346_v16 = vld [vmem:[%s1209_s15 + $0x78] sm:$0xff]  ;;  %455 = vmatpush.xpose.msra.mxu3 %v394_v15  ;;  %v345_v20 = vld [vmem:[%s1209_s15 + $0x70] sm:$0xff]  ;;  %v344_v24 = vld [vmem:[%s1209_s15 + $0x68] sm:$0xff] }
  0xca   : > { %v362_v17 = vld [vmem:[%s1209_s15 + $0xf8] sm:$0xff]  ;;  %395 = vmatpush.xpose.msra.mxu0 %v346_v16  ;;  %v361_v21 = vld [vmem:[%s1209_s15 + $0xf0] sm:$0xff]  ;;  %v360_v25 = vld [vmem:[%s1209_s15 + $0xe8] sm:$0xff] }
  0xcb   : > { %415 = vmatpush.xpose.msra.mxu1 %v362_v17  ;;  %v375_v26 = vld [vmem:[%s1209_s15 + $0x160] sm:$0xff]  ;;  %v374_v30 = vld [vmem:[%s1209_s15 + $0x158] sm:$0xff]  ;;  %v373_v34 = vld [vmem:[%s1209_s15 + $0x150] sm:$0xff] }
  0xcc   : > { %436 = vmatpush.xpose.msra.mxu2 %v377_v18  ;;  %v391_v27 = vld [vmem:[%s1209_s15 + $0x1e0] sm:$0xff]  ;;  %v390_v31 = vld [vmem:[%s1209_s15 + $0x1d8] sm:$0xff]  ;;  %v389_v35 = vld [vmem:[%s1209_s15 + $0x1d0] sm:$0xff] }
  0xcd   : > { %456 = vmatpush.xpose.msra.mxu3 %v393_v19  ;;  %v343_v28 = vld [vmem:[%s1209_s15 + $0x60] sm:$0xff]  ;;  %v342_v32 = vld [vmem:[%s1209_s15 + $0x58] sm:$0xff]  ;;  %v341_v36 = vld [vmem:[%s1209_s15 + $0x50] sm:$0xff] }
  0xce   : > { %396 = vmatpush.xpose.msra.mxu0 %v345_v20  ;;  %v359_v29 = vld [vmem:[%s1209_s15 + $0xe0] sm:$0xff]  ;;  %v358_v33 = vld [vmem:[%s1209_s15 + $0xd8] sm:$0xff]  ;;  %v357_v37 = vld [vmem:[%s1209_s15 + $0xd0] sm:$0xff] }
  0xcf   : > { %416 = vmatpush.xpose.msra.mxu1 %v361_v21  ;;  %v372_v38 = vld [vmem:[%s1209_s15 + $0x148] sm:$0xff]  ;;  %v371_v42 = vld [vmem:[%s1209_s15 + $0x140] sm:$0xff]  ;;  %v370_v46 = vld [vmem:[%s1209_s15 + $0x138] sm:$0xff] }
  0xd0   : > { %437 = vmatpush.xpose.msra.mxu2 %v376_v22  ;;  %v388_v39 = vld [vmem:[%s1209_s15 + $0x1c8] sm:$0xff]  ;;  %v387_v43 = vld [vmem:[%s1209_s15 + $0x1c0] sm:$0xff]  ;;  %v386_v47 = vld [vmem:[%s1209_s15 + $0x1b8] sm:$0xff] }
  0xd1   : > { %457 = vmatpush.xpose.msra.mxu3 %v392_v23  ;;  %v340_v40 = vld [vmem:[%s1209_s15 + $0x48] sm:$0xff]  ;;  %v339_v44 = vld [vmem:[%s1209_s15 + $0x40] sm:$0xff]  ;;  %v338_v48 = vld [vmem:[%s1209_s15 + $0x38] sm:$0xff] }
  0xd2   : > { %397 = vmatpush.xpose.msra.mxu0 %v344_v24  ;;  %v356_v41 = vld [vmem:[%s1209_s15 + $0xc8] sm:$0xff]  ;;  %v355_v45 = vld [vmem:[%s1209_s15 + $0xc0] sm:$0xff]  ;;  %v354_v49 = vld [vmem:[%s1209_s15 + $0xb8] sm:$0xff] }
  0xd3   : > { %417 = vmatpush.xpose.msra.mxu1 %v360_v25  ;;  %v369_v50 = vld [vmem:[%s1209_s15 + $0x130] sm:$0xff]  ;;  %v368_v54 = vld [vmem:[%s1209_s15 + $0x128] sm:$0xff]  ;;  %v367_v58 = vld [vmem:[%s1209_s15 + $0x120] sm:$0xff] }
  0xd4   : > { %438 = vmatpush.xpose.msra.mxu2 %v375_v26  ;;  %v385_v51 = vld [vmem:[%s1209_s15 + $0x1b0] sm:$0xff]  ;;  %v384_v55 = vld [vmem:[%s1209_s15 + $0x1a8] sm:$0xff]  ;;  %v383_v59 = vld [vmem:[%s1209_s15 + $0x1a0] sm:$0xff] }
  0xd5   : > { %458 = vmatpush.xpose.msra.mxu3 %v391_v27  ;;  %v337_v52 = vld [vmem:[%s1209_s15 + $0x30] sm:$0xff]  ;;  %v336_v56 = vld [vmem:[%s1209_s15 + $0x28] sm:$0xff]  ;;  %v335_v60 = vld [vmem:[%s1209_s15 + $0x20] sm:$0xff] }
  0xd6   : > { %398 = vmatpush.xpose.msra.mxu0 %v343_v28  ;;  %v353_v53 = vld [vmem:[%s1209_s15 + $0xb0] sm:$0xff]  ;;  %v352_v57 = vld [vmem:[%s1209_s15 + $0xa8] sm:$0xff]  ;;  %v351_v61 = vld [vmem:[%s1209_s15 + $0xa0] sm:$0xff] }
  0xd7   : > { %418 = vmatpush.xpose.msra.mxu1 %v359_v29  ;;  %v366_v62 = vld [vmem:[%s1209_s15 + $0x118] sm:$0xff]  ;;  %v365_v2 = vld [vmem:[%s1209_s15 + $0x110] sm:$0xff]  ;;  %v364_v6 = vld [vmem:[%s1209_s15 + $0x108] sm:$0xff] }
  0xd8   : > { %439 = vmatpush.xpose.msra.mxu2 %v374_v30  ;;  %v382_v63 = vld [vmem:[%s1209_s15 + $0x198] sm:$0xff]  ;;  %v381_v3 = vld [vmem:[%s1209_s15 + $0x190] sm:$0xff]  ;;  %v380_v7 = vld [vmem:[%s1209_s15 + $0x188] sm:$0xff] }
  0xd9   : > { %459 = vmatpush.xpose.msra.mxu3 %v390_v31  ;;  %v334_v0 = vld [vmem:[%s1209_s15 + $0x18] sm:$0xff]  ;;  %v333_v4 = vld [vmem:[%s1209_s15 + $0x10] sm:$0xff]  ;;  %v332_v8 = vld [vmem:[%s1209_s15 + $0x8] sm:$0xff] }
  0xda   : > { %399 = vmatpush.xpose.msra.mxu0 %v342_v32  ;;  %v350_v1 = vld [vmem:[%s1209_s15 + $0x98] sm:$0xff]  ;;  %v349_v5 = vld [vmem:[%s1209_s15 + $0x90] sm:$0xff]  ;;  %v348_v9 = vld [vmem:[%s1209_s15 + $0x88] sm:$0xff] }
  0xdb   : > { %419 = vmatpush.xpose.msra.mxu1 %v358_v33  ;;  %v363_v10 = vld [vmem:[%s1209_s15 + $0x100] sm:$0xff]  ;;  %v490_v33 = vld [vmem:[#allocation4] sm:$0xff] }
  0xdc   : > { %440 = vmatpush.xpose.msra.mxu2 %v373_v34  ;;  %v379_v11 = vld [vmem:[%s1209_s15 + $0x180] sm:$0xff] }
  0xdd   : > { %460 = vmatpush.xpose.msra.mxu3 %v389_v35  ;;  %v331_v12 = vld [vmem:[%s1209_s15] sm:$0xff] }
  0xde   : > { %400 = vmatpush.xpose.msra.mxu0 %v341_v36  ;;  %v347_v13 = vld [vmem:[%s1209_s15 + $0x80] sm:$0xff] }
  0xdf   : > { %420 = vmatpush.xpose.msra.mxu1 %v357_v37  ;;  %v330_v14 = vld [vmem:[#allocation2] sm:$0xff] }
  0xe0   : > { %441 = vmatpush.xpose.msra.mxu2 %v372_v38 }
  0xe1   : > { %461 = vmatpush.xpose.msra.mxu3 %v388_v39 }
  0xe2   : > { %401 = vmatpush.xpose.msra.mxu0 %v340_v40 }
  0xe3   : > { %421 = vmatpush.xpose.msra.mxu1 %v356_v41 }
  0xe4   : > { %442 = vmatpush.xpose.msra.mxu2 %v371_v42 }
  0xe5   : > { %462 = vmatpush.xpose.msra.mxu3 %v387_v43 }
  0xe6   : > { %402 = vmatpush.xpose.msra.mxu0 %v339_v44 }
  0xe7   : > { %422 = vmatpush.xpose.msra.mxu1 %v355_v45 }
  0xe8   : > { %443 = vmatpush.xpose.msra.mxu2 %v370_v46 }
  0xe9   : > { %463 = vmatpush.xpose.msra.mxu3 %v386_v47 }
  0xea   : > { %403 = vmatpush.xpose.msra.mxu0 %v338_v48 }
  0xeb   : > { %423 = vmatpush.xpose.msra.mxu1 %v354_v49 }
  0xec   : > { %444 = vmatpush.xpose.msra.mxu2 %v369_v50 }
  0xed   : > { %464 = vmatpush.xpose.msra.mxu3 %v385_v51 }
  0xee   : > { %404 = vmatpush.xpose.msra.mxu0 %v337_v52 }
  0xef   : > { %424 = vmatpush.xpose.msra.mxu1 %v353_v53 }
  0xf0   : > { %445 = vmatpush.xpose.msra.mxu2 %v368_v54 }
  0xf1   : > { %465 = vmatpush.xpose.msra.mxu3 %v384_v55 }
  0xf2   : > { %405 = vmatpush.xpose.msra.mxu0 %v336_v56 }
  0xf3   : > { %425 = vmatpush.xpose.msra.mxu1 %v352_v57 }
  0xf4   : > { %446 = vmatpush.xpose.msra.mxu2 %v367_v58 }
  0xf5   : > { %466 = vmatpush.xpose.msra.mxu3 %v383_v59 }
  0xf6   : > { %406 = vmatpush.xpose.msra.mxu0 %v335_v60 }
  0xf7   : > { %426 = vmatpush.xpose.msra.mxu1 %v351_v61 }
  0xf8   : > { %447 = vmatpush.xpose.msra.mxu2 %v366_v62 }
  0xf9   : > { %467 = vmatpush.xpose.msra.mxu3 %v382_v63 }
  0xfa   : > { %407 = vmatpush.xpose.msra.mxu0 %v334_v0 }
  0xfb   : > { %427 = vmatpush.xpose.msra.mxu1 %v350_v1 }
  0xfc   : > { %448 = vmatpush.xpose.msra.mxu2 %v365_v2 }
  0xfd   : > { %468 = vmatpush.xpose.msra.mxu3 %v381_v3 }
  0xfe   : > { %408 = vmatpush.xpose.msra.mxu0 %v333_v4 }
  0xff   : > { %428 = vmatpush.xpose.msra.mxu1 %v349_v5 }
 0x100   : > { %449 = vmatpush.xpose.msra.mxu2 %v364_v6 }
 0x101   : > { %469 = vmatpush.xpose.msra.mxu3 %v380_v7 }
 0x102   : > { %409 = vmatpush.xpose.msra.mxu0 %v332_v8 }
 0x103   : > { %429 = vmatpush.xpose.msra.mxu1 %v348_v9 }
 0x104   : > { %450 = vmatpush.xpose.msra.mxu2 %v363_v10 }
 0x105   : > { %470 = vmatpush.xpose.msra.mxu3 %v379_v11 }
 0x106   : > { %410 = vmatpush.xpose.msra.mxu0 %v331_v12 }
 0x107   : > { %430 = vmatpush.xpose.msra.mxu1 %v347_v13  ;;  %451 = vmatmul.f32.vlgmr.msra.gmra.mxu2 %v330_v14 }
 0x108   : > { %471 = vmatmul.f32.vlgmr.msra.gmra.mxu3 %v330_v14 }
 0x109   : > { %411 = vmatmul.f32.vlgmr.msra.gmra.mxu0 %v330_v14 }
 0x10a   : > { %431 = vmatmul.f32.vlgmr.msra.gmra.mxu1 %v330_v14 }
 0x186   : > { %v412_v15 = vpop.f32.mrf.mxu0 }
 0x187   : > { %v432_v16 = vpop.f32.mrf.mxu1  ;;  %v774_v17 = vadd.f32 -5.0, %v412_v15 }
 0x188   : > { %v775_v18 = vadd.f32 -5.0, %v432_v16 }
 0x189   : > { %v479_v19 = vmul.f32 1.442695, %v774_v17 }
 0x18a   : > { %v481_v20 = vmul.f32 1.442695, %v775_v18  ;;  %v452_v21 = vpop.f32.mrf.mxu2 }
 0x18b   : > { %864 = vpow2.f32 %v479_v19  ;;  %v472_v22 = vpop.f32.mrf.mxu3  ;;  %v776_v23 = vadd.f32 -5.0, %v452_v21 }
 0x18c   : > { %866 = vpow2.f32 %v481_v20  ;;  %v777_v24 = vadd.f32 -5.0, %v472_v22 }
 0x18d   : > { %v483_v25 = vmul.f32 1.442695, %v776_v23 }
 0x18e   : > { %v485_v26 = vmul.f32 1.442695, %v777_v24 }
 0x18f   : > { %868 = vpow2.f32 %v483_v25 }
 0x190   : > { %870 = vpow2.f32 %v485_v26 }
 0x191   : > { %v865_v27 = vpop.eup %864 }
 0x192   : > { %v867_v28 = vpop.eup %866 }
 0x193   : > { %v487_v29 = vadd.f32 %v867_v28, %v865_v27 }
 0x195   : > { %v869_v30 = vpop.eup %868 }
 0x196   : > { %v871_v31 = vpop.eup %870  ;;  %v488_v32 = vadd.f32 %v869_v30, %v487_v29 }
 0x198   : > { %v489_v34 = vadd.f32 %v871_v31, %v488_v32  ;;  %496 = sbr.rel (%p778_p1) target bundleno = 737 (0x2e1), region = 52 }
 0x19a   : > { %v491_v35 = vadd.f32 %v490_v33, %v489_v34 }
 0x19c   : > { %492 = vst [vmem:[#allocation4] sm:$0xff] %v491_v35 }
 0x19d   : > { %v497_v36 = vld [vmem:[#allocation5] sm:$0x3]  ;;  %vm501_vm3 = vcmask 1041408   ;;  %v498_v38 = vld [vmem:[#allocation5 + $0x2] sm:$0x3]  ;;  %vm565_vm10 = vcmask 1041409  }
 0x19e   : > { %v499_v37 = vmul.f32 %v497_v36, %v497_v36  ;;  %v500_v40 = vmul.f32 %v498_v38, %v498_v38  ;;  %v534_v63 = vld [vmem:[#allocation3] sm:$0xff]  ;;  %vm542_vm11 = vcmask 1043459   ;;  %vm546_vm12 = vcmask 1043458  }
 0x19f   : > { %vm651_vm13 = vcmask 3074   ;;  %vm654_vm14 = vcmask 1024  }
 0x1a0   : > { %v502_v39 = vsel %vm501_vm3, %v499_v37, 0.0  ;;  %v505_v41 = vsel %vm501_vm3, %v500_v40, 0.0 }
 0x1a1   : > { %503 = vadd.xlane.f32.xlu0 %v502_v39 }
 0x1a3   : > { %v535_v49 = vld [vmem:[#allocation4] sm:$0xff] }
 0x1a9   : > { %506 = vadd.xlane.f32.xlu0 %v505_v41 }
 0x1b1   : > { %536 = vadd.xlane.f32.xlu0 %v535_v49 }
 0x214   : > { %v504_v42 = vpop.xlane.xlu0 %503 }
 0x215   : > { %v508_v43 = vmax.f32 %v504_v42, 1e-24 }
 0x217   : > { %872 = vrsqrt.f32 %v508_v43  ;;  %vm516_vm5 = vweird.f32 %v508_v43 }
 0x21c   : > { %v507_v44 = vpop.xlane.xlu0 %506 }
 0x21d   : > { %v873_v45 = vpop.eup %872  ;;  %v509_v46 = vmax.f32 %v507_v44, 1e-24 }
 0x21e   : > { %v511_v47 = vmul.f32 %v873_v45, %v508_v43  ;;  %vm517_vm4 = vweird.f32 %v873_v45 }
 0x21f   : > { %874 = vrsqrt.f32 %v509_v46  ;;  %vm518_vm6 = vmor %vm516_vm5, %vm517_vm4  ;;  %vm526_vm8 = vweird.f32 %v509_v46 }
 0x220   : > { %v512_v48 = vmul.f32 %v873_v45, %v511_v47 }
 0x222   : > { %v513_v50 = vmul.f32 0.5, %v512_v48 }
 0x224   : > { %v514_v51 = vsub.f32 1.5, %v513_v50  ;;  %v537_v31 = vpop.xlane.xlu0 %536 }
 0x225   : > { %v875_v52 = vpop.eup %874 }
 0x226   : > { %v515_v53 = vmul.f32 %v873_v45, %v514_v51  ;;  %v521_v54 = vmul.f32 %v875_v52, %v509_v46  ;;  %vm527_vm7 = vweird.f32 %v875_v52 }
 0x227   : > { %vm528_vm9 = vmor %vm526_vm8, %vm527_vm7 }
 0x228   : > { %v519_v55 = vsel %vm518_vm6, %v873_v45, %v515_v53  ;;  %v522_v56 = vmul.f32 %v875_v52, %v521_v54 }
 0x229   : > { %v530_v57 = vmul.f32 %v519_v55, %v497_v36 }
 0x22a   : > { %v523_v58 = vmul.f32 0.5, %v522_v56 }
 0x22b   : > { %532 = vst [vmem:[#allocation11] sm:$0x3] %v530_v57  ;;  %v564_v0 = vrot.slane %v530_v57, 1  ;;  %v540_v2 = vrot.slane %v530_v57, 6  ;;  %v623_v7 = vrot.slane %v530_v57, 7 }
 0x22c   : > { %v524_v59 = vsub.f32 1.5, %v523_v58 }
 0x22e   : > { %v525_v60 = vmul.f32 %v875_v52, %v524_v59 }
 0x230   : > { %v529_v61 = vsel %vm528_vm9, %v875_v52, %v525_v60 }
 0x231   : > { %v531_v62 = vmul.f32 %v529_v61, %v498_v38 }
 0x233   : > { %533 = vst [vmem:[#allocation11 + $0x2] sm:$0x3] %v531_v62  ;;  %v566_v1 = vsel %vm565_vm10, %v531_v62, %v564_v0  ;;  %v541_v3 = vrot.slane %v531_v62, 5  ;;  %v624_v4 = vrot.slane %v531_v62, 6  ;;  %v592_v8 = vrot.slane %v531_v62, 7 }
 0x234   : > { %v568_v5 = vmul.f32 %v566_v1, %v534_v63 }
 0x235   : > { %v543_v6 = vsel %vm542_vm11, %v541_v3, %v540_v2  ;;  %v625_v11 = vsel %vm542_vm11, %v624_v4, %v623_v7  ;;  %v593_v13 = vsel %vm565_vm10, %v592_v8, %v530_v57 }
 0x236   : > { %v569_v9 = vsel %vm501_vm3, %v568_v5, 0.0  ;;  %v545_v10 = vmul.f32 %v543_v6, %v534_v63  ;;  %v627_v14 = vmul.f32 %v625_v11, %v534_v63  ;;  %v595_v15 = vmul.f32 %v593_v13, %v534_v63 }
 0x237   : > { %570 = vadd.xlane.f32.xlu2 %v569_v9 }
 0x238   : > { %v547_v12 = vsel %vm546_vm12, %v545_v10, 0.0  ;;  %v628_v16 = vsel %vm546_vm12, %v627_v14, 0.0  ;;  %v596_v17 = vsel %vm501_vm3, %v595_v15, 0.0 }
 0x239   : > { %548 = vadd.xlane.f32.xlu1 %v547_v12 }
 0x23f   : > { %629 = vadd.xlane.f32.xlu2 %v628_v16 }
 0x241   : > { %597 = vadd.xlane.f32.xlu1 %v596_v17 }
 0x2aa   : > { %v571_v18 = vpop.xlane.xlu2 %570 }
 0x2ab   : > { %v572_v19 = vmul.f32 5.0, %v571_v18 }
 0x2ac   : > { %v549_v20 = vpop.xlane.xlu1 %548 }
 0x2ad   : > { %v780_v21 = vadd.f32 -5.0, %v572_v19  ;;  %v550_v22 = vmul.f32 5.0, %v549_v20 }
 0x2af   : > { %v574_v23 = vmul.f32 1.442695, %v780_v21  ;;  %v779_v24 = vadd.f32 -5.0, %v550_v22 }
 0x2b1   : > { %876 = vpow2.f32 %v574_v23  ;;  %v552_v25 = vmul.f32 1.442695, %v779_v24 }
 0x2b2   : > { %v630_v26 = vpop.xlane.xlu2 %629 }
 0x2b3   : > { %878 = vpow2.f32 %v552_v25  ;;  %v631_v27 = vmul.f32 5.0, %v630_v26 }
 0x2b4   : > { %v598_v28 = vpop.xlane.xlu1 %597 }
 0x2b5   : > { %v782_v29 = vadd.f32 -5.0, %v631_v27  ;;  %v599_v30 = vmul.f32 5.0, %v598_v28 }
 0x2b7   : > { %v877_v32 = vpop.eup %876  ;;  %v633_v33 = vmul.f32 1.442695, %v782_v29  ;;  %v781_v34 = vadd.f32 -5.0, %v599_v30 }
 0x2b8   : > { %v576_v35 = vadd.f32 %v877_v32, %v537_v31 }
 0x2b9   : > { %v879_v36 = vpop.eup %878  ;;  %880 = vpow2.f32 %v633_v33  ;;  %v601_v37 = vmul.f32 1.442695, %v781_v34 }
 0x2ba   : > { %v554_v38 = vadd.f32 %v879_v36, %v537_v31  ;;  %882 = vlog2.f32 %v576_v35 }
 0x2bb   : > { %884 = vpow2.f32 %v601_v37 }
 0x2bc   : > { %886 = vlog2.f32 %v554_v38 }
 0x2bf   : > { %v881_v39 = vpop.eup %880 }
 0x2c0   : > { %v883_v40 = vpop.eup %882  ;;  %v635_v41 = vadd.f32 %v881_v39, %v537_v31 }
 0x2c1   : > { %v885_v42 = vpop.eup %884  ;;  %v578_v43 = vmul.f32 0.6931472, %v883_v40 }
 0x2c2   : > { %v887_v44 = vpop.eup %886  ;;  %v603_v45 = vadd.f32 %v885_v42, %v537_v31  ;;  %888 = vlog2.f32 %v635_v41 }
 0x2c3   : > { %v556_v46 = vmul.f32 0.6931472, %v887_v44  ;;  %v579_v47 = vadd.f32 5.0, %v578_v43 }
 0x2c4   : > { %890 = vlog2.f32 %v603_v45 }
 0x2c5   : > { %v557_v48 = vadd.f32 5.0, %v556_v46  ;;  %v580_v49 = vsub.f32 %v579_v47, %v572_v19  ;;  %v581_v50 = vsub.f32 %v572_v19, %v579_v47 }
 0x2c7   : > { %v558_v51 = vsub.f32 %v557_v48, %v550_v22  ;;  %v559_v52 = vsub.f32 %v550_v22, %v557_v48  ;;  %v582_v53 = vmul.f32 1.442695, %v581_v50  ;;  %v585_v54 = vrot.slane %v580_v49, 6 }
 0x2c8   : > { %v889_v55 = vpop.eup %888 }
 0x2c9   : > { %v560_v56 = vmul.f32 1.442695, %v559_v52  ;;  %892 = vpow2.f32 %v582_v53  ;;  %v587_v57 = vadd.f32 %v585_v54, %v558_v51  ;;  %v637_v59 = vmul.f32 0.6931472, %v889_v55 }
 0x2ca   : > { %v891_v58 = vpop.eup %890  ;;  %v614_v3 = vrot.slane %v558_v51, 2 }
 0x2cb   : > { %894 = vpow2.f32 %v560_v56  ;;  %v605_v60 = vmul.f32 0.6931472, %v891_v58  ;;  %652 = vst.msk [vmem:[%s1323_s4 - $0x2] sm:$0xc] %vm651_vm13, %v587_v57  ;;  %v638_v61 = vadd.f32 5.0, %v637_v59 }
 0x2cd   : > { %v606_v62 = vadd.f32 5.0, %v605_v60  ;;  %v640_v63 = vsub.f32 %v631_v27, %v638_v61  ;;  %v639_v4 = vsub.f32 %v638_v61, %v631_v27 }
 0x2cf   : > { %v893_v0 = vpop.eup %892  ;;  %v607_v1 = vsub.f32 %v606_v62, %v599_v30  ;;  %v608_v2 = vsub.f32 %v599_v30, %v606_v62  ;;  %v641_v6 = vmul.f32 1.442695, %v640_v63  ;;  %v644_v12 = vrot.slane %v639_v4, 2 }
 0x2d0   : > { %v589_v5 = vrot.slane %v893_v0, 6 }
 0x2d1   : > { %v895_v7 = vpop.eup %894  ;;  %v609_v8 = vmul.f32 1.442695, %v608_v2  ;;  %v616_v9 = vadd.f32 %v614_v3, %v607_v1  ;;  %896 = vpow2.f32 %v641_v6 }
 0x2d2   : > { %v591_v10 = vadd.f32 %v895_v7, %v589_v5  ;;  %v618_v15 = vrot.slane %v895_v7, 2 }
 0x2d3   : > { %898 = vpow2.f32 %v609_v8  ;;  %v621_v11 = vadd.f32 %v616_v9, %v580_v49 }
 0x2d4   : > { %653 = vst.msk [vmem:[%s1324_s5 - $0x2] sm:$0xc] %vm651_vm13, %v591_v10 }
 0x2d5   : > { %v646_v13 = vadd.f32 %v644_v12, %v621_v11 }
 0x2d7   : > { %655 = vst.msk [vmem:[%s1325_s6] sm:$0x3] %vm654_vm14, %v646_v13  ;;  %v897_v14 = vpop.eup %896 }
 0x2d8   : > { %v648_v19 = vrot.slane %v897_v14, 2 }
 0x2d9   : > { %v899_v16 = vpop.eup %898 }
 0x2da   : > { %v620_v17 = vadd.f32 %v899_v16, %v618_v15 }
 0x2dc   : > { %v622_v18 = vadd.f32 %v893_v0, %v620_v17 }
 0x2de   : > { %v650_v20 = vadd.f32 %v648_v19, %v622_v18 }
 0x2e0   : > { %656 = vst.msk [vmem:[%s1326_s7] sm:$0x3] %vm654_vm14, %v650_v20 }
 0x2e1 PF: > { %p818_p4 = scmp.eq.s32.totalorder %s1135_s28, 3  ;;  %s1073_s8 = smov [#allocation11]  }
 0x2e2   : > { %s662_s9 = sshll.u32 %s1073_s8, 4  ;;  %s664_s11 = sshll.u32 %s1322_s3, 4  ;;  %s663_s9 = int_to_ptr.vmem [resolvable:$true] %s662_s9  ;;  %s665_s11 = int_to_ptr.hbm [resolvable:$true] %s664_s11 }
 0x2e3   : > { %s1074_s12 = smov 32   ;;  %s1075_s13 = smov 2  }
 0x2e4   : > { %799 = dma.vmem_to_hbm [thread:$0]  (%p818_p4), %s663_s9, 64, %s665_s11, [#allocation7], %s1074_s12, %s1074_s12, %s1075_s13  }
 0x2e5   : > { %1047 = dma.done.wait (%p818_p4), [#allocation7], 64  }
 0x2e6   : > { %1049 = vsyncadd (%p818_p4), [#allocation7], 4294967232 }
 0x2e7 PF: > { %s1330_s14 = smov %s1174_s24  ;;  %p18_p5 = scmp.ge.s32.totalorder %s1163_s20, 6  }
 0x2e8   : > { %s1331_s24 = smov %s1056_s25  ;;  %s1332_s25 = smov %s1060_s26 }
 0x2e9   : > { %s1333_s26 = smov %s1330_s14  ;;  %s1334_s27 = smov %s1163_s20 }
 0x2ea   :  { %20 = sbr.rel (!%p18_p5) target bundleno = 4 (0x4), region = 116 }
 0x2ef   :  { %705 = vsyncpa [#allocation6], 1 }
 0x2f0   :  { %707 = vsyncpa [#allocation6 + $0x1], 1 }
 0x2f1   :  { %708 = vsyncpa [#allocation9], 1 }
 0x2f2   :  { %709 = vsyncpa [#allocation7], 1 }
 0x2f3   :  { %711 = vsyncpa [#allocation7 + $0x1], 1 }

</bundles_post_ra>
